<compile_context>
chip_gen: v7x
topology: tpu7x:2x2x1
jax: 0.10.0
libtpu: 0.0.40
codegen_flags: <defaults>
</compile_context>

<pallas_src>
import functools

import jax
import jax.numpy as jnp
from jax.experimental import pallas as pl
from jax.experimental.pallas import tpu as pltpu


def _focal_loss_kernel(x_ref, t_ref, o_ref, *, gamma, hw_valid, tile_pixels,
                       num_outer, num_inner, mask_last):
    po = pl.program_id(1)
    pi = pl.program_id(2)

    # Zero the per-(image, outer-block) lane accumulator at the start of the
    # inner (reduction) axis.
    @pl.when(pi == 0)
    def _():
        o_ref[...] = jnp.zeros_like(o_ref)

    x = x_ref[...].astype(jnp.float32)      # (1, C, TP): classes on sublanes
    t = t_ref[...]                          # (1, 1, TP): int32 class ids

    # Stable log-softmax statistics over the class (sublane) axis.
    m = jnp.max(x, axis=1, keepdims=True)                    # (1, 1, TP)
    e = jnp.exp(x - m)                                       # (1, C, TP)
    sumexp = jnp.sum(e, axis=1, keepdims=True)               # (1, 1, TP)

    # Target-class logit via compare + select along the class axis
    # (no dynamic gather on TPU, no bool->f32 convert).
    cls = jax.lax.broadcasted_iota(jnp.int32, x.shape, 1)
    logit_t = jnp.sum(jnp.where(cls == t, x, 0.0), axis=1, keepdims=True)

    ce = (m - logit_t) + jnp.log(sumexp)                     # per-pixel CE
    pt = jnp.exp(-ce)                                        # == softmax prob of target

    base = 1.0 - pt
    g = float(gamma)
    if g == round(g) and 0.0 <= g <= 8.0:
        gi = int(round(g))
        if gi == 0:
            w = jnp.ones_like(base)
        else:
            w = base
            for _ in range(gi - 1):
                w = w * base
    else:
        w = jnp.maximum(base, 0.0) ** g
    fl = w * ce                                              # (1, 1, TP)

    if not mask_last:
        # H*W divisible by the tile: hot path is a bare accumulate.
        o_ref[...] += fl
    else:
        is_last = jnp.logical_and(po == num_outer - 1, pi == num_inner - 1)

        @pl.when(jnp.logical_not(is_last))
        def _():
            o_ref[...] += fl

        @pl.when(is_last)
        def _():
            # Select (not multiply-by-mask): padding lanes may be inf/NaN.
            p_global = po * num_inner + pi
            lane = jax.lax.broadcasted_iota(jnp.int32, fl.shape, 2)
            valid = (p_global * tile_pixels + lane) < hw_valid
            o_ref[...] += jnp.where(valid, fl, 0.0)


def _round_up(x, m):
    return ((x + m - 1) // m) * m


def focal_loss_v2(inputs_nchw, targets_nhw, *, gamma=2, tile_pixels=65536):
    """inputs_nchw: (N, C, H, W) float logits; targets_nhw: (N, H, W) int class ids."""
    N, C, H, W = inputs_nchw.shape
    HW = H * W
    M = N * HW

    x3 = inputs_nchw.reshape(N, C, HW)                  # free reshape, no transpose
    t3 = targets_nhw.reshape(N, 1, HW).astype(jnp.int32)
    x_item = x3.dtype.itemsize
    t_item = 4

    # --- VMEM budgeting (generation-aware, conservative fallback = v7x 64 MiB).
    try:
        phys_vmem = int(pltpu.get_tpu_info().vmem_capacity_bytes)
    except Exception:
        phys_vmem = 64 * 1024 * 1024
    vmem_limit = min(phys_vmem, 128 * 1024 * 1024)
    budget = int(vmem_limit * 0.4)      # tile-sizing budget: leave pipeline/regalloc headroom

    # Per-pixel VMEM bytes of one grid step:
    #   2x double-buffered logits + 2x targets + 2x f32 output block
    #   + ~4 (C, TP)-sized f32/i32 intermediates (x_f32, e, masked-x, class iota)
    #   + ~10 (1, TP) f32 temps (m, sumexp, logit_t, ce, pt, ...).
    per_pixel = (2 * C * x_item) + (2 * t_item) + (2 * 4) + (4 * C * 4) + (10 * 4)
    cap_pixels = max(128, (budget // per_pixel) // 128 * 128)

    tp = min(int(tile_pixels), cap_pixels, _round_up(HW, 128))
    tp = max(128, (tp // 128) * 128)
    num_p = -(-HW // tp)
    mask_last = (HW % tp) != 0

    # Second parallel pixel axis: keeps both v7x TensorCores busy even at N == 1.
    if num_p % 2 == 0 and num_p >= 2:
        num_outer = 2
    else:
        num_outer = 1
    num_inner = num_p // num_outer

    kernel = functools.partial(
        _focal_loss_kernel,
        gamma=float(gamma),
        hw_valid=HW,
        tile_pixels=tp,
        num_outer=num_outer,
        num_inner=num_inner,
        mask_last=mask_last,
    )

    cost = pl.CostEstimate(
        flops=int(N * HW * (8 * C + 16)),
        transcendentals=int(N * HW * (C + 2)),            # exp per class + log + exp(-ce)
        bytes_accessed=int(x3.size * x_item + t3.size * t_item + N * num_outer * tp * 4),
    )

    partials = pl.pallas_call(
        kernel,
        out_shape=jax.ShapeDtypeStruct((N, num_outer, tp), jnp.float32),
        grid_spec=pltpu.PrefetchScalarGridSpec(
            num_scalar_prefetch=0,
            grid=(N, num_outer, num_inner),
            in_specs=[
                pl.BlockSpec((1, C, tp),
                             lambda n, po, pi: (n, 0, po * num_inner + pi)),
                pl.BlockSpec((1, 1, tp),
                             lambda n, po, pi: (n, 0, po * num_inner + pi)),
            ],
            out_specs=pl.BlockSpec((1, 1, tp), lambda n, po, pi: (n, po, 0)),
        ),
        compiler_params=pltpu.CompilerParams(
            dimension_semantics=("parallel", "parallel", "arbitrary"),
            vmem_limit_bytes=int(vmem_limit * 0.9),
        ),
        cost_estimate=cost,
    )(x3, t3)

    # Tiny final reduction + mean in plain JAX.
    return jnp.sum(partials) / jnp.float32(M)


def _focal_loss_ref(inputs_nchw, targets_nhw, gamma=2):
    N, C, H, W = inputs_nchw.shape
    x = jnp.transpose(inputs_nchw, (0, 2, 3, 1)).reshape(-1, C).astype(jnp.float32)
    t = targets_nhw.reshape(-1)
    lse = jax.scipy.special.logsumexp(x, axis=-1)
    ce = lse - jnp.take_along_axis(x, t[:, None], axis=-1)[:, 0]
    pt = jnp.exp(-ce)
    return jnp.mean((1.0 - pt) ** gamma * ce)


if __name__ == "__main__":
    key = jax.random.PRNGKey(0)
    k1, k2 = jax.random.split(key)
    N, C, H, W = 2, 4, 16, 16
    inputs = jax.random.normal(k1, (N, C, H, W), dtype=jnp.float32)
    targets = jax.random.randint(k2, (N, H, W), 0, C, dtype=jnp.int32)

    loss = focal_loss_v2(inputs, targets, gamma=2)
    loss = jax.block_until_ready(loss)

    ref = _focal_loss_ref(inputs, targets, gamma=2)
    # pt is now computed exactly as exp(-ce): tight tolerance vs. the reference.
    assert jnp.allclose(loss, ref, rtol=1e-4, atol=1e-6), (loss, ref)

    print("KERNEL_OK")
</pallas_src>

<mosaic_0001>
module attributes {stable_mosaic.version = 11 : i64} {
  func.func @_focal_loss_kernel(%arg0: i32, %arg1: i32, %arg2: i32, %arg3: memref<1x4x256xf32, #tpu.memory_space<vmem>>, %arg4: memref<1x1x256xi32, #tpu.memory_space<vmem>>, %arg5: memref<1x1x256xf32, #tpu.memory_space<vmem>>) attributes {dimension_semantics = [#tpu.dimension_semantics<parallel>, #tpu.dimension_semantics<parallel>, #tpu.dimension_semantics<arbitrary>], iteration_bounds = array<i64: 2, 1, 1>, scalar_prefetch = 0 : i64, scratch_operands = 0 : i64, tpu.core_type = #tpu.core_type<tc>, window_params = [{transform_indices = @transform_0, window_bounds = array<i64: 1, 4, 256>}, {transform_indices = @transform_1, window_bounds = array<i64: 1, 1, 256>}, {transform_indices = @transform_2, window_bounds = array<i64: 1, 1, 256>}]} {
    %c0_i32 = arith.constant 0 : i32
    %0 = arith.cmpi eq, %arg2, %c0_i32 : i32
    %1 = arith.extui %0 : i1 to i32
    %c0_i32_0 = arith.constant 0 : i32
    %2 = arith.cmpi ne, %1, %c0_i32_0 : i32
    scf.if %2 {
      %cst_17 = arith.constant 0.000000e+00 : f32
      %32 = vector.broadcast %cst_17 : f32 to vector<1x1x256xf32>
      %c0_18 = arith.constant 0 : index
      %c0_19 = arith.constant 0 : index
      %c0_20 = arith.constant 0 : index
      %33 = vector.load %arg5[%c0_18, %c0_19, %c0_20] : memref<1x1x256xf32, #tpu.memory_space<vmem>>, vector<1x1x256xf32>
      tpu.vector_store %arg5[%c0_18, %c0_19, %c0_20], %32 {strides = array<i32>} : memref<1x1x256xf32, #tpu.memory_space<vmem>>, vector<1x1x256xf32>,
    } else {
    }
    %c0 = arith.constant 0 : index
    %c0_1 = arith.constant 0 : index
    %c0_2 = arith.constant 0 : index
    %3 = vector.load %arg3[%c0, %c0_1, %c0_2] : memref<1x4x256xf32, #tpu.memory_space<vmem>>, vector<1x4x256xf32>
    %c0_3 = arith.constant 0 : index
    %c0_4 = arith.constant 0 : index
    %c0_5 = arith.constant 0 : index
    %4 = vector.load %arg4[%c0_3, %c0_4, %c0_5] : memref<1x1x256xi32, #tpu.memory_space<vmem>>, vector<1x1x256xi32>
    %cst = arith.constant dense<0xFF800000> : vector<1x256xf32>
    %5 = vector.multi_reduction <maximumf>, %3, %cst [1] : vector<1x4x256xf32> to vector<1x256xf32>
    %6 = vector.shape_cast %5 : vector<1x256xf32> to vector<1x1x256xf32>
    %7 = vector.broadcast %6 : vector<1x1x256xf32> to vector<1x4x256xf32>
    %8 = arith.subf %3, %7 : vector<1x4x256xf32>
    %9 = math.exp %8 : vector<1x4x256xf32>
    %cst_6 = arith.constant dense<0.000000e+00> : vector<1x256xf32>
    %10 = vector.multi_reduction <add>, %9, %cst_6 [1] : vector<1x4x256xf32> to vector<1x256xf32>
    %11 = vector.shape_cast %10 : vector<1x256xf32> to vector<1x1x256xf32>
    %12 = tpu.iota {dimensions = array<i32: 1>} : vector<1x4x256xi32>
    %13 = vector.broadcast %4 : vector<1x1x256xi32> to vector<1x4x256xi32>
    %14 = arith.cmpi eq, %12, %13 : vector<1x4x256xi32>
    %cst_7 = arith.constant 0.000000e+00 : f32
    %15 = vector.broadcast %cst_7 : f32 to vector<1x4x256xf32>
    %16 = arith.select %14, %3, %15 : vector<1x4x256xi1>, vector<1x4x256xf32>
    %cst_8 = arith.constant dense<0.000000e+00> : vector<1x256xf32>
    %17 = vector.multi_reduction <add>, %16, %cst_8 [1] : vector<1x4x256xf32> to vector<1x256xf32>
    %18 = vector.shape_cast %17 : vector<1x256xf32> to vector<1x1x256xf32>
    %19 = arith.subf %6, %18 : vector<1x1x256xf32>
    %20 = math.log %11 : vector<1x1x256xf32>
    %21 = arith.addf %19, %20 : vector<1x1x256xf32>
    %cst_9 = arith.constant 0.000000e+00 : f32
    %22 = vector.broadcast %cst_9 : f32 to vector<1x1x256xf32>
    %23 = arith.subf %22, %21 : vector<1x1x256xf32>
    %24 = math.exp %23 : vector<1x1x256xf32>
    %cst_10 = arith.constant 1.000000e+00 : f32
    %25 = vector.broadcast %cst_10 : f32 to vector<1x1x256xf32>
    %26 = arith.subf %25, %24 : vector<1x1x256xf32>
    %27 = arith.mulf %26, %26 : vector<1x1x256xf32>
    %28 = arith.mulf %27, %21 : vector<1x1x256xf32>
    %c0_11 = arith.constant 0 : index
    %c0_12 = arith.constant 0 : index
    %c0_13 = arith.constant 0 : index
    %29 = vector.load %arg5[%c0_11, %c0_12, %c0_13] : memref<1x1x256xf32, #tpu.memory_space<vmem>>, vector<1x1x256xf32>
    %30 = arith.addf %29, %28 : vector<1x1x256xf32>
    %c0_14 = arith.constant 0 : index
    %c0_15 = arith.constant 0 : index
    %c0_16 = arith.constant 0 : index
    %31 = vector.load %arg5[%c0_14, %c0_15, %c0_16] : memref<1x1x256xf32, #tpu.memory_space<vmem>>, vector<1x1x256xf32>
    tpu.vector_store %arg5[%c0_14, %c0_15, %c0_16], %30 {strides = array<i32>} : memref<1x1x256xf32, #tpu.memory_space<vmem>>, vector<1x1x256xf32>,
    return
  }
  func.func @transform_0(%arg0: i32, %arg1: i32, %arg2: i32) -> (i32, i32, i32) {
    %c1_i32 = arith.constant 1 : i32
    %0 = arith.muli %arg1, %c1_i32 : i32
    %1 = arith.addi %0, %arg2 : i32
    %c0_i32 = arith.constant 0 : i32
    %c0_i32_0 = arith.constant 0 : i32
    return %arg0, %c0_i32, %1 : i32, i32, i32
  }
  func.func @transform_1(%arg0: i32, %arg1: i32, %arg2: i32) -> (i32, i32, i32) {
    %c1_i32 = arith.constant 1 : i32
    %0 = arith.muli %arg1, %c1_i32 : i32
    %1 = arith.addi %0, %arg2 : i32
    %c0_i32 = arith.constant 0 : i32
    %c0_i32_0 = arith.constant 0 : i32
    return %arg0, %c0_i32, %1 : i32, i32, i32
  }
  func.func @transform_2(%arg0: i32, %arg1: i32, %arg2: i32) -> (i32, i32, i32) {
    %c0_i32 = arith.constant 0 : i32
    %c0_i32_0 = arith.constant 0 : i32
    return %arg0, %arg1, %c0_i32 : i32, i32, i32
  }
}

</mosaic_0001>

<bundles_post_ra>
// kernel: tpu_custom_call.1
= control target key start
LH: loop header
LB: loop body
LE: loop exit
PB: predicated region body
PF: predicated region fallthrough
CT: control target
= control target key end

     0   :  { %7 = vsyncpa [#allocation3], 0  ;;  %s1007_s0 = inlined_call_operand.hbm [shape: f32[2,4,256], index: 0, kind: input, shape index: {}]   ;;  %s1008_s1 = inlined_call_operand.hbm [shape: s32[2,1,256], index: 1, kind: input, shape index: {}]   ;;  %s1009_s2 = inlined_call_operand.hbm [shape: f32[2,1,256], index: 2, kind: output, shape index: {}]  }
   0x1   :  { %9 = vsyncpa [#allocation3 + $0x1], 0 }
   0x2   :  { %10 = vsyncpa [#allocation6], 0 }
   0x3   :  { %12 = vsyncpa [#allocation6 + $0x1], 0 }
   0x4   :  { %13 = vsyncpa [#allocation4], 0 }
   0x5   :  { %15 = vsyncpa [#allocation4 + $0x1], 0  ;;  %s765_s9 = smov 0   ;;  %s767_s10 = smov 0  }
   0x6   :  { %s769_s11 = smov 0   ;;  %s771_s12 = smov 0  }
   0x7   :  { %s773_s13 = smov 0   ;;  %s775_s14 = smov 0  }
   0x8 LB: > { %s495_s15 = sadd.s32 4294967295, %s743_s14   ;;  %s496_s16 = sadd.s32 4294967294, %s743_s14   ;;  %s743_s14 = sphi %s775_s14, %s21_s14   ;;  %s739_s13 = sphi %s773_s13, %s1031_s13   ;;  %s735_s12 = sphi %s771_s12, %s1030_s12   ;;  %s731_s11 = sphi %s769_s11, %s1029_s11   ;;  %s727_s10 = sphi %s767_s10, %s1028_s10   ;;  %s723_s9 = sphi %s765_s9, %s1027_s9  }
   0x9   : > { %s40_s17 = sadd.s32 1, %s739_s13  ;;  %s51_s18 = sadd.s32 1, %s731_s11 }
   0xa   : > { %p42_p0 = scmp.ge.s32.totalorder %s40_s17, 2  ;;  %p58_p1 = scmp.ne.s32.totalorder %s731_s11, %s727_s10 }
   0xb   : > { %p59_p2 = scmp.eq.s32.totalorder %s743_s14, 0  ;;  %p64_p3 = scmp.ne.s32.totalorder %s727_s10, %s723_s9 }
   0xc   : > { %s1033_s17 = smov (%p42_p0, %s40_s17), 0  ;;  %p65_p5 = scmp.eq.s32.totalorder %s495_s15, 0 }
   0xd   : > { %p806_p4 = por %p59_p2, %p58_p1  ;;  %s46_s20 = ssub.s32 %s739_s13, %s1033_s17 }
   0xe   : > { %p120_p6 = scmp.eq.s32.totalorder %s495_s15, 1  ;;  %p49_p7 = scmp.eq.s32.totalorder %s46_s20, 0 }
   0xf   : > { %p812_p8 = por %p65_p5, %p64_p3  ;;  %p126_p10 = scmp.eq.s32.totalorder %s496_s16, 1 }
  0x10   : > { %p816_p9 = por %p120_p6, %p58_p1  ;;  %p534_p13 = scmp.lt.s32.totalorder %s743_s14, 2 }
  0x11   : > { %s1013_s21 = scalar_select %p812_p8, 1, 0 }
  0x12   : > { %s1014_s22 = scalar_select %p816_p9, 1, 0 }
  0x13   : > { %s821_s23 = scalar_select %p49_p7, %s731_s11, %s51_s18  }
  0x14   : > { %p823_p11 = por %p126_p10, %p64_p3  ;;  %s830_s25 = sand.u32 1, %s731_s11  }
  0x15   : > { %s499_s26 = sshll.u32 %s830_s25, 3  ;;  %s514_s27 = sshll.u32 %s739_s13, 7 }
  0x16   : > { %s1015_s24 = scalar_select %p823_p11, 1, 0 }
  0x17   : > { %s837_s30 = scalar_lea.hbm %s1007_s0, %s514_s27  ;;  %s150_s3 = scalar_lea.vmem [#allocation2], %s499_s26 }
  0x18   : > { %s161_s4 = sshll.u32 %s150_s3, 4  ;;  %p843_p0 = pnand %p534_p13, %p806_p4  ;;  %s839_s4 = int_to_ptr.vmem [resolvable:$true] %s161_s4 }
  0x19   : > { %s147_s6 = scalar_lea.sflag [#allocation3], %s830_s25  ;;  %s597_s7 = scalar_lea.hbm %s837_s30, 128 }
  0x1a   : > { %p598_p3 = scmp.ne.s32.totalorder %s837_s30, %s597_s7  ;;  %p599_p5 = pneg %p843_p0 }
  0x1b   : > { %s602_s16 = scalar_lea.hbm %s1007_s0, 256  ;;  %p603_p4 = scmp.lt.u32.totalorder %s837_s30, %s1007_s0 }
  0x1c   : > { %p600_p6 = pnand %p599_p5, %p598_p3  ;;  %p604_p10 = scmp.lt.u32.totalorder %s602_s16, %s597_s7 }
  0x1d   : > { %p606_p12 = scmp.lt.u32.totalorder %s597_s7, %s837_s30 }
  0x1e   : > { %p601_p7 = pneg %p600_p6  ;;  %p605_p13 = por %p604_p10, %p603_p4 }
  0x20   : > { %p607_p1 = por %p606_p12, %p605_p13 }
  0x22   : > { %p608_p2 = pnand %p607_p1, %p601_p7 }
  0x24   : > { %611 = shalt.err (!%p608_p2)
}
  0x25   : > { %s612_s20 = scalar_lea.vmem %s839_s4, 128  ;;  %s745_s26 = smov [#allocation2]  }
  0x26   : > { %p613_p3 = scmp.ne.s32.totalorder %s839_s4, %s612_s20  ;;  %s617_s27 = sshll.u32 %s745_s26, 4  ;;  %s618_s27 = int_to_ptr.vmem [resolvable:$false] %s617_s27 }
  0x27   : > { %s619_s28 = scalar_lea.vmem %s618_s27, 256  ;;  %p620_p9 = scmp.lt.s32.totalorder %s839_s4, %s618_s27 }
  0x28   : > { %p615_p6 = pnand %p613_p3, %p599_p5  ;;  %p621_p4 = scmp.lt.s32.totalorder %s619_s28, %s612_s20 }
  0x2a   : > { %p616_p11 = pneg %p615_p6  ;;  %p622_p10 = por %p621_p4, %p620_p9 }
  0x2c   : > { %p623_p12 = pnand %p622_p10, %p616_p11 }
  0x2e   : > { %626 = shalt.err (!%p623_p12)
}
  0x2f   : > { %526 = dma.hbm_to_vmem [thread:$0]  (!%p843_p0), %s837_s30, 128, %s839_s4, %s147_s6  }
  0x30   : > { %p1017_p1 = scmp.lt.s32.totalorder %s743_s14, 3  ;;  %p1018_p2 = scmp.ge.s32.totalorder %s743_s14, 1 }
  0x31   : > { %s502_s3 = sshll.u32 %s830_s25, 1  ;;  %s515_s7 = sshll.u32 %s739_s13, 5 }
  0x32   : > { %p879_p7 = pnand %p1018_p2, %p1017_p1  ;;  %s888_s16 = scalar_lea.hbm %s1008_s1, %s515_s7 }
  0x33   : > { %s172_s18 = scalar_lea.vmem [#allocation5], %s502_s3  ;;  %s169_s30 = scalar_lea.sflag [#allocation6], %s830_s25 }
  0x34   : > { %s1019_s29 = scalar_select %p879_p7, 1, 0 }
  0x35   : > { %s183_s19 = sshll.u32 %s172_s18, 4  ;;  %s627_s4 = scalar_lea.hbm %s888_s16, 32  ;;  %s184_s19 = int_to_ptr.vmem [resolvable:$true] %s183_s19 }
  0x36   : > { %p628_p9 = scmp.ne.s32.totalorder %s888_s16, %s627_s4  ;;  %s632_s26 = scalar_lea.hbm %s1008_s1, 64 }
  0x37   : > { %p633_p3 = scmp.lt.u32.totalorder %s888_s16, %s1008_s1  ;;  %p634_p6 = scmp.lt.u32.totalorder %s632_s26, %s627_s4 }
  0x38   : > { %p630_p11 = pnand %p628_p9, %p599_p5  ;;  %p636_p10 = scmp.lt.u32.totalorder %s627_s4, %s888_s16 }
  0x39   : > { %p635_p4 = por %p634_p6, %p633_p3 }
  0x3a   : > { %p631_p13 = pneg %p630_p11 }
  0x3b   : > { %p637_p12 = por %p636_p10, %p635_p4 }
  0x3d   : > { %p638_p1 = pnand %p637_p12, %p631_p13 }
  0x3f   : > { %641 = shalt.err (!%p638_p1)
}
  0x40   : > { %s642_s25 = scalar_lea.vmem %s184_s19, 32  ;;  %s746_s3 = smov [#allocation5]  }
  0x41   : > { %p643_p2 = scmp.ne.s32.totalorder %s184_s19, %s642_s25  ;;  %s647_s7 = sshll.u32 %s746_s3, 4  ;;  %s648_s7 = int_to_ptr.vmem [resolvable:$false] %s647_s7 }
  0x42   : > { %s649_s8 = scalar_lea.vmem %s648_s7, 64  ;;  %p650_p8 = scmp.lt.s32.totalorder %s184_s19, %s648_s7 }
  0x43   : > { %p645_p9 = pnand %p643_p2, %p599_p5  ;;  %p651_p7 = scmp.lt.s32.totalorder %s649_s8, %s642_s25 }
  0x45   : > { %p646_p11 = pneg %p645_p9  ;;  %p652_p3 = por %p651_p7, %p650_p8 }
  0x47   : > { %p653_p6 = pnand %p652_p3, %p646_p11 }
  0x49   : > { %656 = shalt.err (!%p653_p6)
}
  0x4a   : > { %529 = dma.hbm_to_vmem [thread:$0]  (!%p843_p0), %s888_s16, 32, %s184_s19, %s169_s30  }
  0x4b   : > { %p1020_p13 = scmp.ne.s32.totalorder %s1019_s29, 0 }
  0x4c   : > { %s913_s15 = sand.u32 (!%p1020_p13), 1, %s727_s10   ;;  %p1021_p5 = scmp.ne.s32.totalorder (!%p1020_p13), %s1013_s21, 0 }
  0x4d   : > { %192 = sbr.rel (%p1020_p13) target bundleno = 194 (0xc2), region = 28  ;;  %s506_s18 = sshll.u32 (!%p1020_p13), %s913_s15, 3 }
  0x4e   : > { %s195_s4 = scalar_lea.sflag (!%p1020_p13), [#allocation3], %s913_s15  ;;  %s198_s6 = scalar_lea.vmem (!%p1020_p13), [#allocation2], %s506_s18 }
  0x54   : > { %710 = dma.done.wait (%p1021_p5), %s195_s4, 128  }
  0x55   : > { %712 = vsyncadd (%p1021_p5), %s195_s4, 4294967168  ;;  %s507_s5 = sshll.u32 %s913_s15, 1  ;;  %s204_s29 = scalar_lea.sflag [#allocation6], %s913_s15 }
  0x56   : > { %s207_s16 = scalar_lea.vmem [#allocation5], %s507_s5 }
  0x57   : > { %714 = dma.done.wait (%p1021_p5), %s204_s29, 32  }
  0x58   : > { %716 = vsyncadd (%p1021_p5), %s204_s29, 4294967264  ;;  %v241_v0 = vlaneseq  ;;  %s931_s19 = scalar_lea.vmem [#allocation7], %s507_s5  ;;  %v747_v2 = vmov 0.0   ;;  %vm251_vm1 = vcmask 1043456   ;;  %v246_v3 = vld [vmem:[%s198_s6] sm:$0xff]  ;;  %s516_s21 = sshll.u32 %s735_s12, 5 }
  0x59   : > { %v249_v4 = vcombine.high %v246_v3, %v246_v3  ;;  %v252_v5 = vsel %vm251_vm1, %v246_v3, -inf  ;;  %v247_v21 = vld [vmem:[%s207_s16] sm:$0x3]  ;;  %s380_s30 = sshll.u32 %s931_s19, 4  ;;  %s955_s27 = scalar_lea.hbm %s1009_s2, %s516_s21  ;;  %s957_s30 = int_to_ptr.vmem [resolvable:$true] %s380_s30 }
  0x5a   : > { %vm927_vm0 = vcmp.lt.s32.totalorder %v241_v0, 256  ;;  %v253_v6 = vrot.slane %v252_v5, 4  ;;  %v938_v16 = vshrl.u32 %v241_v0, 7  ;;  %s364_s28 = scalar_lea.sflag [#allocation4], %s913_s15  ;;  %s657_s25 = scalar_lea.vmem %s957_s30, 32 }
  0x5b   : > { %245 = vst.msk [vmem:[%s931_s19] sm:$0x3] %vm927_vm0, %v747_v2  ;;  %v259_v7 = vsel %vm251_vm1, %v249_v4, -inf  ;;  %p658_p8 = scmp.ne.s32.totalorder %s957_s30, %s657_s25  ;;  %p1024_p0 = scmp.ne.s32.totalorder %s1014_s22, 0 }
  0x5c   : > { %v254_v8 = vmax.f32 %v252_v5, %v253_v6  ;;  %v260_v9 = vrot.slane %v259_v7, 4  ;;  %v294_v20 = vsub.s32 0, %v938_v16  ;;  %v298_v23 = vsub.s32 1, %v938_v16  ;;  %s749_s12 = smov [#allocation7]  }
  0x5d   : > { %p659_p7 = pnand %p658_p8, %p1024_p0  ;;  %s661_s3 = sshll.u32 %s749_s12, 4  ;;  %s662_s3 = int_to_ptr.vmem [resolvable:$false] %s661_s3 }
  0x5e   : > { %v255_v10 = vrot.slane %v254_v8, 2  ;;  %v261_v11 = vmax.f32 %v259_v7, %v260_v9  ;;  %v295_v25 = vrot.slane %v247_v21, %v294_v20  ;;  %v299_v27 = vrot.slane %v247_v21, %v298_v23  ;;  %s663_s7 = scalar_lea.vmem %s662_s3, 64  ;;  %p664_p10 = scmp.lt.s32.totalorder %s957_s30, %s662_s3 }
  0x5f   : > { %v748_v9 = vmov 1966171168   ;;  %p660_p4 = pneg %p659_p7  ;;  %p665_p12 = scmp.lt.s32.totalorder %s663_s7, %s657_s25 }
  0x60   : > { %v256_v12 = vmax.f32 %v254_v8, %v255_v10  ;;  %v262_v13 = vrot.slane %v261_v11, 2  ;;  %vm300_vm2 = vcmp.eq.s32.totalorder %v938_v16, %v295_v25  ;;  %vm301_vm3 = vcmp.eq.s32.totalorder %v938_v16, %v299_v27 }
  0x61   : > { %v302_v28 = vsel %vm300_vm2, %v246_v3, 0.0  ;;  %v303_v29 = vsel %vm301_vm3, %v249_v4, 0.0  ;;  %v343_v10 = vunpack.c.l.s4 %v748_v9  ;;  %p666_p1 = por %p665_p12, %p664_p10 }
  0x62   : > { %v257_v14 = vrot.slane %v256_v12, 1  ;;  %v263_v15 = vmax.f32 %v261_v11, %v262_v13  ;;  %v304_v30 = vsel %vm251_vm1, %v302_v28, 0.0  ;;  %v311_v31 = vsel %vm251_vm1, %v303_v29, 0.0 }
  0x63   : > { %v305_v32 = vrot.slane %v304_v30, 4  ;;  %v312_v36 = vrot.slane %v311_v31, 4  ;;  %p667_p2 = pnand %p666_p1, %p660_p4 }
  0x64   : > { %v258_v17 = vmax.f32 %v256_v12, %v257_v14  ;;  %v264_v18 = vrot.slane %v263_v15, 1 }
  0x65   : > { %v306_v39 = vadd.f32 %v305_v32, %v304_v30  ;;  %v313_v42 = vadd.f32 %v312_v36, %v311_v31 }
  0x66   : > { %v265_v19 = vmax.f32 %v263_v15, %v264_v18 }
  0x67   : > { %v307_v45 = vrot.slane %v306_v39, 2  ;;  %v314_v48 = vrot.slane %v313_v42, 2 }
  0x68   : > { %v268_v22 = vcombine.low %v258_v17, %v265_v19 }
  0x69   : > { %v308_v51 = vadd.f32 %v307_v45, %v306_v39  ;;  %v315_v54 = vadd.f32 %v314_v48, %v313_v42 }
  0x6a   : > { %v270_v24 = vsub.f32 %v246_v3, %v268_v22 }
  0x6b   : > { %v309_v56 = vrot.slane %v308_v51, 1  ;;  %v316_v57 = vrot.slane %v315_v54, 1 }
  0x6c   : > { %v271_v26 = vmul.f32 1.442695, %v270_v24  ;;  %v338_v24 = vld [vmem:[%s931_s19] sm:$0x3] }
  0x6d   : > { %v310_v58 = vadd.f32 %v309_v56, %v308_v51  ;;  %v317_v59 = vadd.f32 %v316_v57, %v315_v54 }
  0x6e   : > { %587 = vpow2.f32 %v271_v26 }
  0x6f   : > { %v318_v60 = vsub.f32 %v258_v17, %v310_v58  ;;  %v319_v62 = vsub.f32 %v265_v19, %v317_v59  ;;  %v344_v17 = vunpack.c.0.s8 %v343_v10 }
  0x71   : > { %v347_v21 = vsub.s32 %v344_v17, %v938_v16 }
  0x78   : > { %v588_v33 = vpop.eup %587 }
  0x79   : > { %v274_v34 = vcombine.high %v588_v33, %v588_v33  ;;  %v276_v35 = vsel %vm251_vm1, %v588_v33, 0.0 }
  0x7a   : > { %v277_v37 = vrot.slane %v276_v35, 4 }
  0x7b   : > { %v283_v38 = vsel %vm251_vm1, %v274_v34, 0.0 }
  0x7c   : > { %v278_v40 = vadd.f32 %v277_v37, %v276_v35  ;;  %v284_v41 = vrot.slane %v283_v38, 4 }
  0x7e   : > { %v279_v43 = vrot.slane %v278_v40, 2  ;;  %v285_v44 = vadd.f32 %v284_v41, %v283_v38 }
  0x80   : > { %v280_v46 = vadd.f32 %v279_v43, %v278_v40  ;;  %v286_v47 = vrot.slane %v285_v44, 2 }
  0x82   : > { %v281_v49 = vrot.slane %v280_v46, 1  ;;  %v287_v50 = vadd.f32 %v286_v47, %v285_v44 }
  0x84   : > { %v282_v52 = vadd.f32 %v281_v49, %v280_v46  ;;  %v288_v53 = vrot.slane %v287_v50, 1 }
  0x86   : > { %v289_v55 = vadd.f32 %v288_v53, %v287_v50  ;;  %589 = vlog2.f32 %v282_v52 }
  0x88   : > { %591 = vlog2.f32 %v289_v55 }
  0x90   : > { %v590_v61 = vpop.eup %589 }
  0x91   : > { %v321_v63 = vmul.f32 0.6931472, %v590_v61 }
  0x92   : > { %v592_v0 = vpop.eup %591 }
  0x93   : > { %v323_v2 = vmul.f32 0.6931472, %v592_v0  ;;  %v324_v3 = vadd.f32 %v321_v63, %v318_v60 }
  0x95   : > { %v325_v4 = vadd.f32 %v323_v2, %v319_v62  ;;  %v326_v5 = vsub.f32 0.0, %v324_v3 }
  0x97   : > { %v327_v6 = vsub.f32 0.0, %v325_v4  ;;  %v328_v7 = vmul.f32 1.442695, %v326_v5 }
  0x99   : > { %593 = vpow2.f32 %v328_v7  ;;  %v330_v8 = vmul.f32 1.442695, %v327_v6 }
  0x9b   : > { %595 = vpow2.f32 %v330_v8 }
  0xa3   : > { %v594_v11 = vpop.eup %593 }
  0xa4   : > { %v332_v12 = vsub.f32 1.0, %v594_v11 }
  0xa5   : > { %v596_v13 = vpop.eup %595 }
  0xa6   : > { %v333_v14 = vsub.f32 1.0, %v596_v13  ;;  %v334_v15 = vmul.f32 %v332_v12, %v332_v12 }
  0xa8   : > { %v335_v18 = vmul.f32 %v333_v14, %v333_v14  ;;  %v336_v19 = vmul.f32 %v334_v15, %v324_v3 }
  0xaa   : > { %v337_v20 = vmul.f32 %v335_v18, %v325_v4 }
  0xac   : > { %v341_v22 = vcombine.low %v336_v19, %v337_v20 }
  0xae   : > { %v348_v23 = vrot.slane %v341_v22, %v347_v21 }
  0xb0   : > { %v355_v25 = vrot.slane %v348_v23, %v347_v21 }
  0xb2   : > { %v357_v26 = vadd.f32 %v355_v25, %v338_v24 }
  0xb4   : > { %362 = vst.msk [vmem:[%s931_s19] sm:$0x3] %vm927_vm0, %v357_v26 }
  0xb5   : > { %670 = shalt.err (!%p667_p2)
}
  0xb6   : > { %s671_s8 = scalar_lea.hbm %s955_s27, 32  ;;  %s675_s4 = scalar_lea.hbm %s1009_s2, 64 }
  0xb7   : > { %p672_p9 = scmp.ne.s32.totalorder %s955_s27, %s671_s8  ;;  %p676_p6 = scmp.lt.u32.totalorder %s955_s27, %s1009_s2 }
  0xb8   : > { %p677_p13 = scmp.lt.u32.totalorder %s675_s4, %s671_s8  ;;  %p679_p8 = scmp.lt.u32.totalorder %s671_s8, %s955_s27 }
  0xb9   : > { %p673_p11 = pnand %p672_p9, %p1024_p0 }
  0xba   : > { %p678_p5 = por %p677_p13, %p676_p6 }
  0xbb   : > { %p674_p3 = pneg %p673_p11 }
  0xbc   : > { %p680_p7 = por %p679_p8, %p678_p5 }
  0xbe   : > { %p681_p4 = pnand %p680_p7, %p674_p3 }
  0xc0   : > { %684 = shalt.err (!%p681_p4)
}
  0xc1   : > { %521 = dma.vmem_to_hbm [thread:$0]  (%p1024_p0), %s957_s30, 32, %s955_s27, %s364_s28  }
  0xc2 PF: > { %s392_s29 = sand.u32 1, %s723_s9   ;;  %p1025_p10 = scmp.ne.s32.totalorder %s1015_s24, 0 }
  0xc3   : > { %p1026_p12 = scmp.ge.s32.totalorder %s743_s14, 2  ;;  %s393_s16 = scalar_lea.sflag [#allocation4], %s392_s29 }
  0xc5   : > { %p531_p1 = pnand %p1026_p12, %p1025_p10 }
  0xc7   : > { %718 = dma.done.wait (!%p531_p1), %s393_s16, 32  }
  0xc8   : > { %720 = vsyncadd (!%p531_p1), %s393_s16, 4294967264  ;;  %s21_s14 = sadd.s32 1, %s743_s14   ;;  %s1027_s9 = smov %s727_s10 }
  0xc9   : > { %p18_p2 = scmp.ge.s32.totalorder %s21_s14, 4   ;;  %s1028_s10 = smov %s731_s11 }
  0xca   : > { %s1029_s11 = smov %s821_s23  ;;  %s1030_s12 = smov %s739_s13 }
  0xcb   : > { %s1031_s13 = smov %s1033_s17  ;;  %20 = sbr.rel (!%p18_p2) target bundleno = 8 (0x8), region = 90 }
  0xd2   :  { %398 = vsyncpa [#allocation3], 1 }
  0xd3   :  { %400 = vsyncpa [#allocation3 + $0x1], 1 }
  0xd4   :  { %401 = vsyncpa [#allocation6], 1 }
  0xd5   :  { %403 = vsyncpa [#allocation6 + $0x1], 1 }
  0xd6   :  { %404 = vsyncpa [#allocation4], 1 }
  0xd7   :  { %406 = vsyncpa [#allocation4 + $0x1], 1 }

</bundles_post_ra>
